<compile_context>
chip_gen: v6e
topology: v6e:2x2x1
jax: 0.10.0
libtpu: 0.0.40
codegen_flags: <defaults>
</compile_context>

<pallas_src>
import jax
import jax.numpy as jnp
from jax.experimental import pallas as pl
from jax.experimental.pallas import tpu as pltpu

STATE_DIM = 4      # CartPole-v1 observation dim
HIDDEN_DIM = 128
BATCH = 8


def value_net_kernel(x_ref, w1_ref, b1_ref, w2_ref, b2_ref, o_ref):
    # fc1: (B, S) @ (S, H) on the MXU; bias add + ReLU on the VPU (one vreg).
    h = jnp.dot(x_ref[...], w1_ref[...], preferred_element_type=jnp.float32)
    h = jnp.maximum(h + b1_ref[...], 0.0)
    # fc2: H -> 1 projection as elementwise mul + lane reduce (VPU/XLU) rather
    # than a second, nearly-empty MXU matmul; scalar bias comes from SMEM.
    v = jnp.sum(h * w2_ref[...], axis=-1, keepdims=True)
    o_ref[...] = v + b2_ref[0]


@jax.jit
def value_net_forward(x, w1, b1, w2, b2):
    """x: (B, state_dim) f32 -> (B, 1) f32, same semantics as ValueNet.forward."""
    B, S = x.shape
    H = w1.shape[1]
    b1_row = b1.reshape(1, H)     # (1, H) VMEM tile, broadcast against (B, H)
    w2_row = w2.reshape(1, H)     # (1, H) VMEM tile
    b2_s = b2.reshape(1)          # (1,) -> SMEM scalar

    itemsize = jnp.dtype(jnp.float32).itemsize
    bytes_accessed = itemsize * (B * S + S * H + H + H + 1 + B)
    flops = 2 * B * S * H + B * H + 2 * B * H + B   # fc1 + bias/relu + fc2

    return pl.pallas_call(
        value_net_kernel,
        out_shape=jax.ShapeDtypeStruct((B, 1), jnp.float32),
        in_specs=[
            pl.BlockSpec(memory_space=pltpu.MemorySpace.VMEM),   # x
            pl.BlockSpec(memory_space=pltpu.MemorySpace.VMEM),   # w1
            pl.BlockSpec(memory_space=pltpu.MemorySpace.VMEM),   # b1 row
            pl.BlockSpec(memory_space=pltpu.MemorySpace.VMEM),   # w2 row
            pl.BlockSpec(memory_space=pltpu.MemorySpace.SMEM),   # b2 scalar
        ],
        out_specs=pl.BlockSpec(memory_space=pltpu.MemorySpace.VMEM),
        cost_estimate=pl.CostEstimate(
            flops=flops, transcendentals=0, bytes_accessed=bytes_accessed),
    )(x, w1, b1_row, w2_row, b2_s)


def init_params(key, state_dim, hidden_dim):
    """Deterministic init mimicking torch.nn.Linear's U(-1/sqrt(fan_in), +)."""
    k1, k2, k3, k4 = jax.random.split(key, 4)
    bound1 = 1.0 / jnp.sqrt(jnp.float32(state_dim))
    bound2 = 1.0 / jnp.sqrt(jnp.float32(hidden_dim))
    # stored as (in, out) = W.T relative to PyTorch's (out, in)
    w1 = jax.random.uniform(k1, (state_dim, hidden_dim), jnp.float32, -bound1, bound1)
    b1 = jax.random.uniform(k2, (hidden_dim,), jnp.float32, -bound1, bound1)
    w2 = jax.random.uniform(k3, (hidden_dim, 1), jnp.float32, -bound2, bound2)
    b2 = jax.random.uniform(k4, (1,), jnp.float32, -bound2, bound2)
    return w1, b1, w2, b2


def reference_forward(x, w1, b1, w2, b2):
    h = jnp.maximum(x @ w1 + b1, 0.0)
    return h @ w2 + b2


if __name__ == "__main__":
    key = jax.random.PRNGKey(0)
    k_params, k_x = jax.random.split(key)
    w1, b1, w2, b2 = init_params(k_params, STATE_DIM, HIDDEN_DIM)
    x = jax.random.normal(k_x, (BATCH, STATE_DIM), jnp.float32)

    out = value_net_forward(x, w1, b1, w2, b2)
    out = jax.block_until_ready(out)

    ref = reference_forward(x, w1, b1, w2, b2)
    assert out.shape == (BATCH, 1)
    assert jnp.allclose(out, ref, atol=1e-5, rtol=1e-5)

    print("KERNEL_OK")
</pallas_src>

<mosaic_0001>
module attributes {stable_mosaic.version = 11 : i64} {
  func.func @value_net_kernel(%arg0: memref<8x4xf32, #tpu.memory_space<vmem>>, %arg1: memref<4x128xf32, #tpu.memory_space<vmem>>, %arg2: memref<1x128xf32, #tpu.memory_space<vmem>>, %arg3: memref<1x128xf32, #tpu.memory_space<vmem>>, %arg4: memref<1xf32, #tpu.memory_space<smem>>, %arg5: memref<8x1xf32, #tpu.memory_space<vmem>>) attributes {dimension_semantics = [], scalar_prefetch = 0 : i64, scratch_operands = 0 : i64, tpu.core_type = #tpu.core_type<tc>} {
    %c0 = arith.constant 0 : index
    %c0_0 = arith.constant 0 : index
    %0 = vector.load %arg0[%c0, %c0_0] : memref<8x4xf32, #tpu.memory_space<vmem>>, vector<8x4xf32>
    %c0_1 = arith.constant 0 : index
    %c0_2 = arith.constant 0 : index
    %1 = vector.load %arg1[%c0_1, %c0_2] : memref<4x128xf32, #tpu.memory_space<vmem>>, vector<4x128xf32>
    %cst = arith.constant dense<0.000000e+00> : vector<8x128xf32>
    %2 = tpu.matmul %0, %1, %cst {dimension_numbers = #tpu.dot_dimension_numbers<[1], [0], [0], [1], [0, 0, 1, 1], [], []>} : vector<8x4xf32>, vector<4x128xf32>, vector<8x128xf32> -> vector<8x128xf32>
    %c0_3 = arith.constant 0 : index
    %c0_4 = arith.constant 0 : index
    %3 = vector.load %arg2[%c0_3, %c0_4] : memref<1x128xf32, #tpu.memory_space<vmem>>, vector<1x128xf32>
    %4 = vector.broadcast %3 : vector<1x128xf32> to vector<8x128xf32>
    %5 = arith.addf %2, %4 : vector<8x128xf32>
    %cst_5 = arith.constant 0.000000e+00 : f32
    %6 = vector.broadcast %cst_5 : f32 to vector<8x128xf32>
    %7 = arith.maximumf %5, %6 : vector<8x128xf32>
    %c0_6 = arith.constant 0 : index
    %c0_7 = arith.constant 0 : index
    %8 = vector.load %arg3[%c0_6, %c0_7] : memref<1x128xf32, #tpu.memory_space<vmem>>, vector<1x128xf32>
    %9 = vector.broadcast %8 : vector<1x128xf32> to vector<8x128xf32>
    %10 = arith.mulf %7, %9 : vector<8x128xf32>
    %cst_8 = arith.constant dense<0.000000e+00> : vector<8xf32>
    %11 = vector.multi_reduction <add>, %10, %cst_8 [1] : vector<8x128xf32> to vector<8xf32>
    %12 = vector.shape_cast %11 : vector<8xf32> to vector<8x1xf32>
    %c0_9 = arith.constant 0 : index
    %13 = memref.load %arg4[%c0_9] : memref<1xf32, #tpu.memory_space<smem>>
    %14 = vector.broadcast %13 : f32 to vector<8x1xf32>
    %15 = arith.addf %12, %14 : vector<8x1xf32>
    %c0_10 = arith.constant 0 : index
    %c0_11 = arith.constant 0 : index
    %16 = vector.load %arg5[%c0_10, %c0_11] : memref<8x1xf32, #tpu.memory_space<vmem>>, vector<8x1xf32>
    tpu.vector_store %arg5[%c0_10, %c0_11], %15 {strides = array<i32>} : memref<8x1xf32, #tpu.memory_space<vmem>>, vector<8x1xf32>,
    return
  }
}

</mosaic_0001>

<bundles_post_ra>
// kernel: value_net_forward.1
= control target key start
LH: loop header
LB: loop body
LE: loop exit
PB: predicated region body
PF: predicated region fallthrough
CT: control target
= control target key end

     0   :  { %vm34_vm0 = vcmask 1043456   ;;  %vm30_vm1 = vcmask 31744   ;;  %v141_v0 = vmov 0.0   ;;  %vm142_vm2 = vmmov 0   ;;  %s191_s1 = inlined_call_operand.vmem [shape: f32[4,128], index: 1, kind: input, shape index: {}]   ;;  %s192_s0 = inlined_call_operand.vmem [shape: f32[8,4], index: 0, kind: input, shape index: {}]   ;;  %s193_s2 = inlined_call_operand.vmem [shape: f32[1,128], index: 2, kind: input, shape index: {}]   ;;  %s194_s3 = inlined_call_operand.vmem [shape: f32[1,128], index: 3, kind: input, shape index: {}]   ;;  %s195_s4 = inlined_call_operand.<no memory space> [shape: f32[1], index: 4, kind: input, shape index: {}]   ;;  %s196_s5 = inlined_call_operand.vmem [shape: f32[8,1], index: 5, kind: output, shape index: {}]  }
   0x1   :  { %134 = vmatprep.subr.mxu0 %v141_v0  ;;  %v22_v1 = vld [vmem:[%s191_s1] sm:$0xf]  ;;  %136 = vmatprep.mubr.msk.f32.mxu0 %vm142_vm2, %v141_v0  ;;  %v120_v10 = vstv %s195_s4  ;;  %vm122_vm3 = vcmask 7168  }
   0x2   :  { %v21_v2 = vld [vmem:[%s192_s0] sm:$0xff]  ;;  %135 = vmatpush3.msk.msra.mxu0 %vm34_vm0, %v22_v1 }
   0x3   :  { %137 = vmatmul.mubr.msk.f32.vlgmr.msra.gmra.mxu0 %vm30_vm1, %v21_v2  ;;  %v128_v3 = vld [vmem:[%s193_s2] ss:$0 sm:$0xff] }
   0x4   :  { %v131_v7 = vld [vmem:[%s194_s3] ss:$0 sm:$0xff] }
  0xc3   :  { %v104_v4 = vpop.f32.mrf.mxu0 }
  0xc4   :  { %v105_v5 = vadd.f32 %v128_v3, %v104_v4 }
  0xc5   :  { %v138_v6 = vpop.f32.mrf.mxu0 }
  0xc6   :  { %v108_v8 = vmax.f32 %v105_v5, 0.0 }
  0xc8   :  { %v116_v9 = vmul.f32 %v131_v7, %v108_v8 }
  0xca   :  { %117 = vadd.xlane.f32.xlu0 %v116_v9 }
 0x153   :  { %v118_v11 = vpop.xlane.xlu0 %117 }
 0x154   :  { %v121_v12 = vadd.f32 %v120_v10, %v118_v11 }
 0x156   :  { %123 = vst.msk [vmem:[%s196_s5] sm:$0xff] %vm122_vm3, %v121_v12 }

</bundles_post_ra>
